<compile_context>
chip_gen: v7x
topology: tpu7x:2x2x1
jax: 0.10.0
libtpu: 0.0.40
codegen_flags: <defaults>
</compile_context>

<pallas_src>
import jax
import jax.numpy as jnp
from jax.experimental import pallas as pl
from jax.experimental.pallas import tpu as pltpu


def attention_gate_kernel(x_ref, g_ref,
                          wxT_ref, bx_ref,
                          wgT_ref, bg_ref,
                          wpsi_ref, bpsi_ref,
                          out_ref):
    # x_ref: [1, Cin, T], g_ref: [1, Cg, T]  (channels on sublanes, spatial on lanes)
    x = x_ref[0].astype(jnp.float32)          # [Cin, T]
    g = g_ref[0].astype(jnp.float32)          # [Cg,  T]

    # 1x1 convs == channel matmuls (MXU); channels are the contracted dim.
    x1 = jnp.dot(wxT_ref[...], x, preferred_element_type=jnp.float32) + bx_ref[...]   # [Ci, T]
    g1 = jnp.dot(wgT_ref[...], g, preferred_element_type=jnp.float32) + bg_ref[...]   # [Ci, T]

    h = jnp.maximum(x1 + g1, 0.0)                                                     # ReLU (VPU)

    # psi projection (out channel == 1): VPU multiply + cross-sublane reduce (XLU)
    # instead of wasting a whole MXU pass on a [*, Ci] x [Ci, 1] matmul.
    a = jnp.sum(h * wpsi_ref[...], axis=0, keepdims=True) + bpsi_ref[...]             # [1, T]
    a = jax.nn.sigmoid(a)                                                             # EUP

    out_ref[0] = (x * a).astype(out_ref.dtype)                                        # sublane broadcast


def attention_gate_pallas(x_nchw, g_nchw, params, *, tile_hw=2048):
    """x_nchw: [N, Cin, H, W], g_nchw: [N, Cg, H, W]. Returns [N, Cin, H, W]."""
    wx, bx, wg, bg, wpsi, bpsi = params
    N, Cin, H, W = x_nchw.shape
    _, Cg, _, _ = g_nchw.shape
    Ci = wx.shape[1]
    HW = H * W

    # Lane-dense spatial tile: multiple of 128, capped at tile_hw, padded if ragged.
    hw_min = pl.cdiv(HW, 128) * 128
    t = min(pl.cdiv(tile_hw, 128) * 128, hw_min)
    hw_pad = pl.cdiv(HW, t) * t

    # NCHW -> [N, C, H*W] is a free view (no transpose passes).
    x3 = x_nchw.reshape(N, Cin, HW)
    g3 = g_nchw.reshape(N, Cg, HW)
    if hw_pad != HW:
        x3 = jnp.pad(x3, ((0, 0), (0, 0), (0, hw_pad - HW)))
        g3 = jnp.pad(g3, ((0, 0), (0, 0), (0, hw_pad - HW)))

    # Tiny weights, pre-arranged for channels-on-sublanes layout.
    wxT = wx.T                        # [Ci, Cin]
    wgT = wg.T                        # [Ci, Cg]
    bxc = bx.reshape(Ci, 1)           # [Ci, 1]
    bgc = bg.reshape(Ci, 1)           # [Ci, 1]
    wpsic = wpsi.reshape(Ci, 1)       # [Ci, 1]
    bpsic = bpsi.reshape(1, 1)        # [1, 1]

    grid = (N, hw_pad // t)

    out3 = pl.pallas_call(
        attention_gate_kernel,
        out_shape=jax.ShapeDtypeStruct((N, Cin, hw_pad), x_nchw.dtype),
        grid_spec=pltpu.PrefetchScalarGridSpec(
            num_scalar_prefetch=0,
            grid=grid,
            in_specs=[
                pl.BlockSpec((1, Cin, t), lambda n, s: (n, 0, s)),   # x tile
                pl.BlockSpec((1, Cg, t),  lambda n, s: (n, 0, s)),   # g tile
                pl.BlockSpec((Ci, Cin),   lambda n, s: (0, 0)),      # W_x^T
                pl.BlockSpec((Ci, 1),     lambda n, s: (0, 0)),      # b_x
                pl.BlockSpec((Ci, Cg),    lambda n, s: (0, 0)),      # W_g^T
                pl.BlockSpec((Ci, 1),     lambda n, s: (0, 0)),      # b_g
                pl.BlockSpec((Ci, 1),     lambda n, s: (0, 0)),      # w_psi (column)
                pl.BlockSpec((1, 1),      lambda n, s: (0, 0)),      # b_psi
            ],
            out_specs=pl.BlockSpec((1, Cin, t), lambda n, s: (n, 0, s)),
        ),
        compiler_params=pltpu.CompilerParams(
            dimension_semantics=("parallel", "parallel")),
    )(x3, g3, wxT, bxc, wgT, bgc, wpsic, bpsic)

    if hw_pad != HW:
        out3 = out3[:, :, :HW]
    return out3.reshape(N, Cin, H, W)


def attention_gate_ref(x_nchw, g_nchw, params):
    """Pure-JAX reference matching the PyTorch forward exactly."""
    wx, bx, wg, bg, wpsi, bpsi = params
    x = jnp.transpose(x_nchw, (0, 2, 3, 1)).astype(jnp.float32)   # NHWC
    g = jnp.transpose(g_nchw, (0, 2, 3, 1)).astype(jnp.float32)
    x1 = x @ wx + bx
    g1 = g @ wg + bg
    h = jax.nn.relu(g1 + x1)
    a = jax.nn.sigmoid(h @ wpsi + bpsi)
    out = x * a
    return jnp.transpose(out, (0, 3, 1, 2)).astype(x_nchw.dtype)


def init_params(key, in_channels, gating_channels, inter_channels):
    """Deterministic synthetic parameters (shapes match the nn.Conv2d layers).
    Stored as [Cin, Cout] matmul weights (== Conv2d 1x1 weight transposed)."""
    ks = jax.random.split(key, 6)
    scale = 0.2
    wx = scale * jax.random.normal(ks[0], (in_channels, inter_channels), jnp.float32)
    bx = scale * jax.random.normal(ks[1], (1, inter_channels), jnp.float32)
    wg = scale * jax.random.normal(ks[2], (gating_channels, inter_channels), jnp.float32)
    bg = scale * jax.random.normal(ks[3], (1, inter_channels), jnp.float32)
    wpsi = scale * jax.random.normal(ks[4], (inter_channels, 1), jnp.float32)
    bpsi = scale * jax.random.normal(ks[5], (1, 1), jnp.float32)
    return (wx, bx, wg, bg, wpsi, bpsi)


if __name__ == "__main__":
    key = jax.random.PRNGKey(0)
    k_x, k_g, k_p = jax.random.split(key, 3)

    N, H, W = 2, 16, 16
    in_channels, gating_channels, inter_channels = 4, 8, 16

    x = jax.random.normal(k_x, (N, in_channels, H, W), jnp.float32)
    g = jax.random.normal(k_g, (N, gating_channels, H, W), jnp.float32)
    params = init_params(k_p, in_channels, gating_channels, inter_channels)

    out = attention_gate_pallas(x, g, params)
    out = jax.block_until_ready(out)

    ref = attention_gate_ref(x, g, params)
    assert out.shape == (N, in_channels, H, W)
    assert jnp.allclose(out, ref, atol=1e-5, rtol=1e-5), "mismatch vs reference"

    print("KERNEL_OK")
</pallas_src>

<mosaic_0001>
module attributes {stable_mosaic.version = 11 : i64} {
  func.func @attention_gate_kernel(%arg0: i32, %arg1: i32, %arg2: memref<1x4x256xf32, #tpu.memory_space<vmem>>, %arg3: memref<1x8x256xf32, #tpu.memory_space<vmem>>, %arg4: memref<16x4xf32, #tpu.memory_space<vmem>>, %arg5: memref<16x1xf32, #tpu.memory_space<vmem>>, %arg6: memref<16x8xf32, #tpu.memory_space<vmem>>, %arg7: memref<16x1xf32, #tpu.memory_space<vmem>>, %arg8: memref<16x1xf32, #tpu.memory_space<vmem>>, %arg9: memref<1x1xf32, #tpu.memory_space<vmem>>, %arg10: memref<1x4x256xf32, #tpu.memory_space<vmem>>) attributes {dimension_semantics = [#tpu.dimension_semantics<parallel>, #tpu.dimension_semantics<parallel>], iteration_bounds = array<i64: 2, 1>, scalar_prefetch = 0 : i64, scratch_operands = 0 : i64, tpu.core_type = #tpu.core_type<tc>, window_params = [{transform_indices = @transform_0, window_bounds = array<i64: 1, 4, 256>}, {transform_indices = @transform_1, window_bounds = array<i64: 1, 8, 256>}, {pipeline_mode = #tpu.pipeline_mode<synchronous>, transform_indices = @transform_2, window_bounds = array<i64: 16, 4>}, {pipeline_mode = #tpu.pipeline_mode<synchronous>, transform_indices = @transform_3, window_bounds = array<i64: 16, 1>}, {pipeline_mode = #tpu.pipeline_mode<synchronous>, transform_indices = @transform_4, window_bounds = array<i64: 16, 8>}, {pipeline_mode = #tpu.pipeline_mode<synchronous>, transform_indices = @transform_5, window_bounds = array<i64: 16, 1>}, {pipeline_mode = #tpu.pipeline_mode<synchronous>, transform_indices = @transform_6, window_bounds = array<i64: 16, 1>}, {pipeline_mode = #tpu.pipeline_mode<synchronous>, transform_indices = @transform_7, window_bounds = array<i64: 1, 1>}, {transform_indices = @transform_8, window_bounds = array<i64: 1, 4, 256>}]} {
    %c0 = arith.constant 0 : index
    %c0_0 = arith.constant 0 : index
    %c0_1 = arith.constant 0 : index
    %0 = vector.load %arg2[%c0, %c0_0, %c0_1] : memref<1x4x256xf32, #tpu.memory_space<vmem>>, vector<1x4x256xf32>
    %1 = vector.shape_cast %0 : vector<1x4x256xf32> to vector<4x256xf32>
    %c0_2 = arith.constant 0 : index
    %c0_3 = arith.constant 0 : index
    %c0_4 = arith.constant 0 : index
    %2 = vector.load %arg3[%c0_2, %c0_3, %c0_4] : memref<1x8x256xf32, #tpu.memory_space<vmem>>, vector<1x8x256xf32>
    %3 = vector.shape_cast %2 : vector<1x8x256xf32> to vector<8x256xf32>
    %c0_5 = arith.constant 0 : index
    %c0_6 = arith.constant 0 : index
    %4 = vector.load %arg4[%c0_5, %c0_6] : memref<16x4xf32, #tpu.memory_space<vmem>>, vector<16x4xf32>
    %cst = arith.constant dense<0.000000e+00> : vector<16x256xf32>
    %5 = tpu.matmul %4, %1, %cst {dimension_numbers = #tpu.dot_dimension_numbers<[1], [0], [0], [1], [0, 0, 1, 1], [], []>} : vector<16x4xf32>, vector<4x256xf32>, vector<16x256xf32> -> vector<16x256xf32>
    %c0_7 = arith.constant 0 : index
    %c0_8 = arith.constant 0 : index
    %6 = vector.load %arg5[%c0_7, %c0_8] : memref<16x1xf32, #tpu.memory_space<vmem>>, vector<16x1xf32>
    %7 = vector.broadcast %6 : vector<16x1xf32> to vector<16x256xf32>
    %8 = arith.addf %5, %7 : vector<16x256xf32>
    %c0_9 = arith.constant 0 : index
    %c0_10 = arith.constant 0 : index
    %9 = vector.load %arg6[%c0_9, %c0_10] : memref<16x8xf32, #tpu.memory_space<vmem>>, vector<16x8xf32>
    %cst_11 = arith.constant dense<0.000000e+00> : vector<16x256xf32>
    %10 = tpu.matmul %9, %3, %cst_11 {dimension_numbers = #tpu.dot_dimension_numbers<[1], [0], [0], [1], [0, 0, 1, 1], [], []>} : vector<16x8xf32>, vector<8x256xf32>, vector<16x256xf32> -> vector<16x256xf32>
    %c0_12 = arith.constant 0 : index
    %c0_13 = arith.constant 0 : index
    %11 = vector.load %arg7[%c0_12, %c0_13] : memref<16x1xf32, #tpu.memory_space<vmem>>, vector<16x1xf32>
    %12 = vector.broadcast %11 : vector<16x1xf32> to vector<16x256xf32>
    %13 = arith.addf %10, %12 : vector<16x256xf32>
    %14 = arith.addf %8, %13 : vector<16x256xf32>
    %cst_14 = arith.constant 0.000000e+00 : f32
    %15 = vector.broadcast %cst_14 : f32 to vector<16x256xf32>
    %16 = arith.maximumf %14, %15 : vector<16x256xf32>
    %c0_15 = arith.constant 0 : index
    %c0_16 = arith.constant 0 : index
    %17 = vector.load %arg8[%c0_15, %c0_16] : memref<16x1xf32, #tpu.memory_space<vmem>>, vector<16x1xf32>
    %18 = vector.broadcast %17 : vector<16x1xf32> to vector<16x256xf32>
    %19 = arith.mulf %16, %18 : vector<16x256xf32>
    %cst_17 = arith.constant dense<0.000000e+00> : vector<256xf32>
    %20 = vector.multi_reduction <add>, %19, %cst_17 [0] : vector<16x256xf32> to vector<256xf32>
    %21 = vector.shape_cast %20 : vector<256xf32> to vector<1x256xf32>
    %c0_18 = arith.constant 0 : index
    %c0_19 = arith.constant 0 : index
    %22 = vector.load %arg9[%c0_18, %c0_19] : memref<1x1xf32, #tpu.memory_space<vmem>>, vector<1x1xf32>
    %23 = vector.broadcast %22 : vector<1x1xf32> to vector<1x256xf32>
    %24 = arith.addf %21, %23 : vector<1x256xf32>
    %25 = arith.negf %24 : vector<1x256xf32>
    %26 = math.exp %25 : vector<1x256xf32>
    %cst_20 = arith.constant 1.000000e+00 : f32
    %27 = vector.broadcast %cst_20 : f32 to vector<1x256xf32>
    %28 = arith.addf %27, %26 : vector<1x256xf32>
    %29 = arith.divf %27, %28 : vector<1x256xf32>
    %30 = vector.broadcast %29 : vector<1x256xf32> to vector<4x256xf32>
    %31 = arith.mulf %1, %30 : vector<4x256xf32>
    %c0_21 = arith.constant 0 : index
    %c0_22 = arith.constant 0 : index
    %c0_23 = arith.constant 0 : index
    %32 = vector.load %arg10[%c0_21, %c0_22, %c0_23] : memref<1x4x256xf32, #tpu.memory_space<vmem>>, vector<1x4x256xf32>
    %33 = vector.shape_cast %32 : vector<1x4x256xf32> to vector<4x256xf32>
    %34 = vector.shape_cast %31 : vector<4x256xf32> to vector<1x4x256xf32>
    tpu.vector_store %arg10[%c0_21, %c0_22, %c0_23], %34 {strides = array<i32>} : memref<1x4x256xf32, #tpu.memory_space<vmem>>, vector<1x4x256xf32>,
    return
  }
  func.func @transform_0(%arg0: i32, %arg1: i32) -> (i32, i32, i32) {
    %c0_i32 = arith.constant 0 : i32
    %c0_i32_0 = arith.constant 0 : i32
    return %arg0, %c0_i32, %arg1 : i32, i32, i32
  }
  func.func @transform_1(%arg0: i32, %arg1: i32) -> (i32, i32, i32) {
    %c0_i32 = arith.constant 0 : i32
    %c0_i32_0 = arith.constant 0 : i32
    return %arg0, %c0_i32, %arg1 : i32, i32, i32
  }
  func.func @transform_2(%arg0: i32, %arg1: i32) -> (i32, i32) {
    %c0_i32 = arith.constant 0 : i32
    %c0_i32_0 = arith.constant 0 : i32
    %c0_i32_1 = arith.constant 0 : i32
    return %c0_i32, %c0_i32_0 : i32, i32
  }
  func.func @transform_3(%arg0: i32, %arg1: i32) -> (i32, i32) {
    %c0_i32 = arith.constant 0 : i32
    %c0_i32_0 = arith.constant 0 : i32
    %c0_i32_1 = arith.constant 0 : i32
    return %c0_i32, %c0_i32_0 : i32, i32
  }
  func.func @transform_4(%arg0: i32, %arg1: i32) -> (i32, i32) {
    %c0_i32 = arith.constant 0 : i32
    %c0_i32_0 = arith.constant 0 : i32
    %c0_i32_1 = arith.constant 0 : i32
    return %c0_i32, %c0_i32_0 : i32, i32
  }
  func.func @transform_5(%arg0: i32, %arg1: i32) -> (i32, i32) {
    %c0_i32 = arith.constant 0 : i32
    %c0_i32_0 = arith.constant 0 : i32
    %c0_i32_1 = arith.constant 0 : i32
    return %c0_i32, %c0_i32_0 : i32, i32
  }
  func.func @transform_6(%arg0: i32, %arg1: i32) -> (i32, i32) {
    %c0_i32 = arith.constant 0 : i32
    %c0_i32_0 = arith.constant 0 : i32
    %c0_i32_1 = arith.constant 0 : i32
    return %c0_i32, %c0_i32_0 : i32, i32
  }
  func.func @transform_7(%arg0: i32, %arg1: i32) -> (i32, i32) {
    %c0_i32 = arith.constant 0 : i32
    %c0_i32_0 = arith.constant 0 : i32
    %c0_i32_1 = arith.constant 0 : i32
    return %c0_i32, %c0_i32_0 : i32, i32
  }
  func.func @transform_8(%arg0: i32, %arg1: i32) -> (i32, i32, i32) {
    %c0_i32 = arith.constant 0 : i32
    %c0_i32_0 = arith.constant 0 : i32
    return %arg0, %c0_i32, %arg1 : i32, i32, i32
  }
}

</mosaic_0001>

<bundles_post_ra>
// kernel: tpu_custom_call.1
= control target key start
LH: loop header
LB: loop body
LE: loop exit
PB: predicated region body
PF: predicated region fallthrough
CT: control target
= control target key end

     0   :  { %s1150_s0 = inlined_call_operand.vmem [shape: f32[2,4,256], index: 0, kind: input, shape index: {}]   ;;  %s1151_s1 = inlined_call_operand.vmem [shape: f32[2,8,256], index: 1, kind: input, shape index: {}]   ;;  %s1152_s2 = inlined_call_operand.vmem [shape: f32[16,4], index: 2, kind: input, shape index: {}]   ;;  %s1153_s3 = inlined_call_operand.vmem [shape: f32[16,1], index: 3, kind: input, shape index: {}]   ;;  %s1154_s4 = inlined_call_operand.vmem [shape: f32[16,8], index: 4, kind: input, shape index: {}]   ;;  %s1155_s5 = inlined_call_operand.vmem [shape: f32[16,1], index: 5, kind: input, shape index: {}]   ;;  %s1156_s6 = inlined_call_operand.vmem [shape: f32[16,1], index: 6, kind: input, shape index: {}]   ;;  %s1157_s7 = inlined_call_operand.<no memory space> [shape: f32[1,1], index: 7, kind: input, shape index: {}]   ;;  %s1158_s8 = inlined_call_operand.hbm [shape: f32[2,4,256], index: 8, kind: output, shape index: {}]  }
   0x1   :  { %v13_v0 = vstv %s1157_s7 }
   0x2   :  { %14 = vst [vmem:[#allocation2] sm:$0x1] %v13_v0 }
   0x3   :  { %15 = vsyncpa [#allocation4], 0 }
   0x4   :  { %17 = vsyncpa [#allocation4 + $0x1], 0  ;;  %s995_s29 = smov 0   ;;  %s997_s30 = smov 0  }
   0x5   :  { %s999_s9 = smov 0   ;;  %s1001_s10 = smov 0  }
   0x6   :  { %s1003_s11 = smov 0   ;;  %s1005_s12 = smov 0  }
   0x7 LB: > { %1161 = sst [smem:[#allocation6_spill]] %s938_s11  ;;  %s758_s7 = sadd.s32 4294967295, %s942_s12   ;;  %s942_s12 = sphi %s1005_s12, %s23_s12   ;;  %s938_s11 = sphi %s1003_s11, %s1166_s11   ;;  %s934_s10 = sphi %s1001_s10, %s1165_s10   ;;  %s930_s9 = sphi %s999_s9, %s1169_s9   ;;  %s926_s30 = sphi %s997_s30, %s1168_s30   ;;  %s922_s29 = sphi %s995_s29, %s1167_s29  }
   0x8   : > { %s759_s13 = sadd.s32 4294967294, %s942_s12   ;;  %s35_s14 = sadd.s32 1, %s938_s11 }
   0x9   : > { %s226_s15 = sadd.s32 1, %s930_s9  ;;  %p37_p0 = scmp.ge.s32.totalorder %s35_s14, 2 }
   0xa   : > { %p236_p1 = scmp.ne.s32.totalorder %s930_s9, %s926_s30  ;;  %p237_p2 = scmp.eq.s32.totalorder %s758_s7, 1 }
   0xb   : > { %p242_p3 = scmp.ne.s32.totalorder %s926_s30, %s922_s29  ;;  %s1171_s14 = smov (%p37_p0, %s35_s14), 0 }
   0xc   : > { %1162 = sst [smem:[#allocation7_spill]] %s1171_s14  ;;  %p1035_p4 = por %p237_p2, %p236_p1 }
   0xd   : > { %p243_p5 = scmp.eq.s32.totalorder %s759_s13, 1  ;;  %s221_s17 = ssub.s32 %s938_s11, %s1171_s14 }
   0xe   : > { %p762_p6 = scmp.ge.s32.totalorder %s942_s12, 1  ;;  %p224_p7 = scmp.eq.s32.totalorder %s221_s17, 0 }
   0xf   : > { %p1042_p8 = por %p243_p5, %p242_p3  ;;  %p305_p9 = scmp.lt.s32.totalorder %s942_s12, 3 }
  0x10   : > { %s1048_s19 = scalar_select %p224_p7, %s930_s9, %s226_s15  }
  0x11   : > { %p306_p10 = pnand %p762_p6, %p305_p9 }
  0x12   : > { %p353_p11 = scmp.lt.s32.totalorder (!%p306_p10), %s934_s10, 1  ;;  %v944_v1 = vmov (!%p306_p10), 0.0   ;;  %v378_v2 = vld [vmem:[%s1153_s3] sm:$0xff] (!%p306_p10)  ;;  %v945_v3 = vmov (!%p306_p10), 0   ;;  %v379_v5 = vld [vmem:[%s1153_s3 + $0x8] sm:$0xff] (!%p306_p10)  ;;  %vm399_vm0 = vcmask (!%p306_p10), 1043456   ;;  %v623_v52 = vlaneseq (!%p306_p10) }
  0x13   : > { %309 = sbr.rel (%p306_p10) target bundleno = 322 (0x142), region = 52  ;;  %468 = vmatprep.mubr.f32.mxu1 (!%p306_p10), %v944_v1  ;;  %566 = vmatprep.mubr.f32.mxu0 (!%p306_p10), %v944_v1  ;;  %v483_v4 = vld [vmem:[%s1155_s5] sm:$0xff] (!%p306_p10)  ;;  %v484_v7 = vld [vmem:[%s1155_s5 + $0x8] sm:$0xff] (!%p306_p10)  ;;  %vm495_vm1 = vcmask (!%p306_p10), 64512   ;;  %vm392_vm2 = vcmask (!%p306_p10), 31744   ;;  %s349_s17 = sand.u32 (!%p306_p10), 1, %s926_s30  }
  0x14   : > { %853 = vset.pattern.permute.xlu0 (!%p306_p10), %v945_v3  ;;  %854 = vset.pattern.permute.xlu1 (!%p306_p10), %v945_v3  ;;  %v481_v6 = vld [vmem:[%s1154_s4] sm:$0xff] (!%p306_p10)  ;;  %v588_v14 = vld [vmem:[%s1156_s6 + $0x8] sm:$0xff] (!%p306_p10)  ;;  %v624_v57 = vshrl.u32 (!%p306_p10), %v623_v52, 7  ;;  %s763_s20 = sshll.u32 (!%p306_p10), %s349_s17, 3  ;;  %s648_s14 = scalar_lea.sflag (!%p306_p10), [#allocation4], %s349_s17 }
  0x15   : > { %382 = vperm.xlu0 (!%p306_p10), %853, %v378_v2   ;;  %487 = vperm.xlu1 (!%p306_p10), %854, %v483_v4   ;;  %v376_v12 = vld [vmem:[%s1152_s2] sm:$0xff] (!%p306_p10)  ;;  %v482_v15 = vld [vmem:[%s1154_s4 + $0x8] sm:$0xff] (!%p306_p10)  ;;  %s351_s23 = scalar_lea.vmem (!%p306_p10), [#allocation3], %s763_s20 }
  0x16   : > { %v587_v13 = vld [vmem:[%s1156_s6] sm:$0xff] (!%p306_p10)  ;;  %v377_v16 = vld [vmem:[%s1152_s2 + $0x8] sm:$0xff] (!%p306_p10)  ;;  %v625_v62 = vsub.s32 (!%p306_p10), 0, %v624_v57  ;;  %s664_s24 = sshll.u32 (!%p306_p10), %s351_s23, 4  ;;  %s1105_s24 = int_to_ptr.vmem [resolvable:$true] %s664_s24 }
  0x17   : > { %v617_v17 = vld [vmem:[#allocation2] sm:$0x1] (!%p306_p10) }
  0x19   : > { %387 = vperm.xlu0 (!%p306_p10), %853, %v379_v5   ;;  %492 = vperm.xlu1 (!%p306_p10), %854, %v484_v7  }
  0x1a   : > { %s354_s22 = scalar_select %p353_p11, %s934_s10, 1 }
  0x1c   : > { %s781_s25 = sshll.u32 %s354_s22, 3  ;;  %s782_s26 = sshll.u32 %s354_s22, 4 }
  0x1d   : > { %s360_s15 = scalar_lea.vmem %s1150_s0, %s781_s25  ;;  %s370_s21 = scalar_lea.vmem %s1151_s1, %s782_s26  ;;  %591 = vperm.xlu0 %853, %v587_v13   ;;  %596 = vperm.xlu1 %854, %v588_v14  }
  0x1e   : > { %v1073_v8 = vld [vmem:[%s360_s15] sm:$0xff]  ;;  %v375_v9 = vld [vmem:[%s370_s21 + $0x8] sm:$0xff]  ;;  %s864_s26 = scalar_lea.vmem %s1105_s24, 128 }
  0x1f   : > { %v374_v10 = vld [vmem:[%s370_s21] sm:$0xff]  ;;  %v391_v11 = vcombine.high %v1073_v8, %v1073_v8  ;;  %502 = vmatprep.subr.mxu0 %v375_v9  ;;  %s783_s21 = sshll.u32 %s934_s10, 7  ;;  %p865_p12 = scmp.ne.s32.totalorder %s1105_s24, %s864_s26 }
  0x20   : > { %503 = vmatpush1.msra.mxu0 %v374_v10  ;;  %s1103_s11 = scalar_lea.hbm %s1158_s8, %s783_s21  ;;  %s946_s10 = smov [#allocation3]  }
  0x21   : > { %768 = vmatprep.subr.msk.mxu1 %vm399_vm0, %v391_v11  ;;  %772 = vmatmul.mubr.msk.f32.vlgmr.msra.gmra.mrb[0].mxu0 %vm495_vm1, %v481_v6  ;;  %p866_p13 = pnand %p865_p12, %p1035_p4  ;;  %s868_s27 = sshll.u32 %s946_s10, 4  ;;  %s869_s27 = int_to_ptr.vmem [resolvable:$false] %s868_s27 }
  0x22   : > { %769 = vmatpush1.msk.msra.mxu1 %vm399_vm0, %v1073_v8  ;;  %572 = vmatprep.mubr.f32.mxu0 %v944_v1  ;;  %s870_s28 = scalar_lea.vmem %s869_s27, 256  ;;  %p871_p1 = scmp.lt.s32.totalorder %s1105_s24, %s869_s27 }
  0x23   : > { %770 = vmatmul.mubr.msk.f32.vlgmr.msra.gmra.mrb[0].mxu1 %vm392_vm2, %v376_v12  ;;  %620 = vperm.xlu0 %853, %v617_v17   ;;  %p867_p0 = pneg %p866_p13  ;;  %p872_p2 = scmp.lt.s32.totalorder %s870_s28, %s864_s26 }
  0x24   : > { %474 = vmatprep.mubr.f32.mxu1 %v944_v1 }
  0x25   : > { %773 = vmatmul.mubr.msk.f32.gmra.mrb[2].mxu0 %vm495_vm1, %v482_v15  ;;  %p873_p3 = por %p872_p2, %p871_p1 }
  0x27   : > { %771 = vmatmul.mubr.msk.f32.gmra.mrb[2].mxu1 %vm392_vm2, %v377_v16  ;;  %p874_p5 = pnand %p873_p3, %p867_p0 }
  0x94   : > { %v383_v18 = vpop.permute.xlu0 %382  ;;  %v488_v21 = vpop.permute.xlu1 %487 }
  0x98   : > { %v388_v29 = vpop.permute.xlu0 %387  ;;  %v493_v35 = vpop.permute.xlu1 %492 }
  0x9c   : > { %v592_v45 = vpop.permute.xlu0 %591  ;;  %v597_v46 = vpop.permute.xlu1 %596 }
  0xa2   : > { %v621_v0 = vpop.permute.xlu0 %620 }
  0xa3   : > { %v626_v4 = vrot.slane %v621_v0, %v625_v62 }
  0xf4   : > { %v568_v19 = vpop.f32.mrb[0].mxu0 }
  0xf5   : > { %v570_v20 = vpop.f32.mrb[1].mxu0 }
  0xf6   : > { %v470_v22 = vpop.f32.mrb[0].mxu1 }
  0xf7   : > { %v471_v23 = vadd.f32 %v470_v22, %v383_v18  ;;  %v472_v24 = vpop.f32.mrb[1].mxu1 }
  0xf8   : > { %v473_v25 = vadd.f32 %v472_v24, %v383_v18  ;;  %v574_v26 = vpop.f32.mrb[2].mxu0 }
  0xf9   : > { %v785_v27 = vadd.f32 %v488_v21, %v471_v23  ;;  %v576_v28 = vpop.f32.mrb[3].mxu0 }
  0xfa   : > { %v476_v30 = vpop.f32.mrb[2].mxu1  ;;  %v788_v31 = vadd.f32 %v488_v21, %v473_v25 }
  0xfb   : > { %v786_v32 = vadd.f32 %v785_v27, %v568_v19  ;;  %v477_v33 = vadd.f32 %v476_v30, %v388_v29  ;;  %v478_v34 = vpop.f32.mrb[3].mxu1 }
  0xfc   : > { %v789_v36 = vadd.f32 %v788_v31, %v570_v20  ;;  %v479_v37 = vadd.f32 %v478_v34, %v388_v29 }
  0xfd   : > { %v791_v38 = vadd.f32 %v493_v35, %v477_v33  ;;  %v583_v40 = vmax.f32 %v786_v32, 0.0 }
  0xfe   : > { %v794_v39 = vadd.f32 %v493_v35, %v479_v37  ;;  %v584_v42 = vmax.f32 %v789_v36, 0.0 }
  0xff   : > { %v792_v41 = vadd.f32 %v791_v38, %v574_v26  ;;  %v599_v48 = vmul.f32 %v592_v45, %v583_v40 }
 0x100   : > { %v795_v43 = vadd.f32 %v794_v39, %v576_v28  ;;  %v600_v50 = vmul.f32 %v592_v45, %v584_v42 }
 0x101   : > { %v585_v44 = vmax.f32 %v792_v41, 0.0 }
 0x102   : > { %v586_v47 = vmax.f32 %v795_v43, 0.0 }
 0x103   : > { %v601_v49 = vmul.f32 %v597_v46, %v585_v44 }
 0x104   : > { %v602_v51 = vmul.f32 %v597_v46, %v586_v47 }
 0x105   : > { %v603_v53 = vadd.f32 %v601_v49, %v599_v48 }
 0x106   : > { %v610_v54 = vadd.f32 %v602_v51, %v600_v50 }
 0x107   : > { %v604_v55 = vrot.slane %v603_v53, 4 }
 0x108   : > { %v611_v56 = vrot.slane %v610_v54, 4 }
 0x109   : > { %v605_v58 = vadd.f32 %v604_v55, %v603_v53 }
 0x10a   : > { %v612_v59 = vadd.f32 %v611_v56, %v610_v54 }
 0x10b   : > { %v606_v60 = vrot.slane %v605_v58, 2 }
 0x10c   : > { %v613_v61 = vrot.slane %v612_v59, 2 }
 0x10d   : > { %v607_v63 = vadd.f32 %v606_v60, %v605_v58 }
 0x10e   : > { %v614_v1 = vadd.f32 %v613_v61, %v612_v59 }
 0x10f   : > { %v608_v2 = vrot.slane %v607_v63, 1 }
 0x110   : > { %v615_v3 = vrot.slane %v614_v1, 1 }
 0x111   : > { %v609_v5 = vadd.f32 %v608_v2, %v607_v63 }
 0x112   : > { %v616_v6 = vadd.f32 %v615_v3, %v614_v1 }
 0x113   : > { %v627_v7 = vadd.f32 %v626_v4, %v609_v5 }
 0x114   : > { %v628_v9 = vadd.f32 %v626_v4, %v616_v6 }
 0x115   : > { %v774_v10 = vmul.f32 -1.442695, %v627_v7 }
 0x116   : > { %v775_v11 = vmul.f32 -1.442695, %v628_v9 }
 0x117   : > { %856 = vpow2.f32 %v774_v10 }
 0x118   : > { %858 = vpow2.f32 %v775_v11 }
 0x121   : > { %v857_v12 = vpop.eup %856 }
 0x122   : > { %v859_v13 = vpop.eup %858  ;;  %v635_v14 = vadd.f32 1.0, %v857_v12 }
 0x123   : > { %v636_v15 = vadd.f32 1.0, %v859_v13 }
 0x124   : > { %860 = vrcp.f32 %v635_v14 }
 0x125   : > { %862 = vrcp.f32 %v636_v15 }
 0x12e   : > { %v861_v16 = vpop.eup %860 }
 0x12f   : > { %v863_v17 = vpop.eup %862 }
 0x130   : > { %v643_v18 = vcombine.low %v861_v16, %v863_v17 }
 0x132   : > { %v645_v19 = vmul.f32 %v643_v18, %v1073_v8 }
 0x134   : > { %646 = vst [vmem:[%s351_s23] sm:$0xff] %v645_v19 }
 0x135   : > { %877 = shalt.err (!%p874_p5)
}
 0x136   : > { %s878_s7 = scalar_lea.hbm %s1103_s11, 128  ;;  %s882_s17 = scalar_lea.hbm %s1158_s8, 256 }
 0x137   : > { %p879_p6 = scmp.ne.s32.totalorder %s1103_s11, %s878_s7  ;;  %p883_p10 = scmp.lt.u32.totalorder %s1103_s11, %s1158_s8 }
 0x138   : > { %p884_p11 = scmp.lt.u32.totalorder %s882_s17, %s878_s7  ;;  %p886_p13 = scmp.lt.u32.totalorder %s878_s7, %s1103_s11 }
 0x139   : > { %p880_p7 = pnand %p879_p6, %p1035_p4 }
 0x13a   : > { %p885_p12 = por %p884_p11, %p883_p10 }
 0x13b   : > { %p881_p9 = pneg %p880_p7 }
 0x13c   : > { %p887_p0 = por %p886_p13, %p885_p12 }
 0x13e   : > { %p888_p1 = pnand %p887_p0, %p881_p9 }
 0x140   : > { %891 = shalt.err (!%p888_p1)
}
 0x141   : > { %796 = dma.vmem_to_hbm [thread:$0]  (%p1035_p4), %s1105_s24, 128, %s1103_s11, %s648_s14  }
 0x142 PF: > { %p802_p2 = scmp.ge.s32.totalorder %s942_s12, 2  ;;  %s676_s23 = sand.u32 1, %s922_s29  }
 0x143   : > { %s677_s22 = scalar_lea.sflag [#allocation4], %s676_s23 }
 0x144   : > { %p799_p3 = pnand %p802_p2, %p1042_p8 }
 0x146   : > { %917 = dma.done.wait (!%p799_p3), %s677_s22, 128  }
 0x147   : > { %919 = vsyncadd (!%p799_p3), %s677_s22, 4294967168  ;;  %s23_s12 = sadd.s32 1, %s942_s12   ;;  %s1165_s10 = sld [smem:[#allocation6_spill]] }
 0x148   : > { %p20_p5 = scmp.ge.s32.totalorder %s23_s12, 4   ;;  %s1166_s11 = sld [smem:[#allocation7_spill]] }
 0x149   : > { %s1167_s29 = smov %s926_s30  ;;  %s1168_s30 = smov %s930_s9 }
 0x14a   : > { %s1169_s9 = smov %s1048_s19  ;;  %22 = sbr.rel (!%p20_p5) target bundleno = 7 (0x7), region = 90 }
 0x151   :  { %682 = vsyncpa [#allocation4], 1 }
 0x152   :  { %684 = vsyncpa [#allocation4 + $0x1], 1 }

</bundles_post_ra>
